<compile_context>
chip_gen: v7x
topology: tpu7x:2x2x1
jax: 0.10.0
libtpu: 0.0.40
codegen_flags: <defaults>
</compile_context>

<pallas_src>
import math

import jax
import jax.numpy as jnp
from jax.experimental import pallas as pl
from jax.experimental.pallas import tpu as pltpu

_MIB = 1024 * 1024


def _round_down_multiple(v, m):
    return max(m, (v // m) * m)


def _device_kind():
    try:
        return jax.devices()[0].device_kind.lower()
    except Exception:
        return ""


# ---------------------------------------------------------------------------
# Prologue kernels: h = silu(cond) (precomputed) -> linear -> fold into
# per-row (scale, offset) so the streaming pass is a single FMA per element.
# ---------------------------------------------------------------------------
def _adaln_tiled_kernel(h_ref, wa_ref, wm_ref, ws_ref,
                        ba_ref, bm_ref, bs_ref, scale_ref, offset_ref):
    """Column-tiled prologue (D % 128 == 0). Weight chunks come straight from
    the original (D, 3D) layout -> no per-call weight restructure."""
    h = h_ref[...]
    a = jnp.dot(h, wa_ref[...], preferred_element_type=jnp.float32) \
        + ba_ref[...].astype(jnp.float32)
    mu = jnp.dot(h, wm_ref[...], preferred_element_type=jnp.float32) \
        + bm_ref[...].astype(jnp.float32)
    s = jnp.dot(h, ws_ref[...], preferred_element_type=jnp.float32) \
        + bs_ref[...].astype(jnp.float32)
    # x + a*(x*(1+s) + mu) == x*(1 + a*(1+s)) + a*mu
    scale_ref[...] = 1.0 + a * (1.0 + s)
    offset_ref[...] = a * mu


def _adaln_full_kernel(h_ref, w_ref, b_ref, scale_ref, offset_ref):
    """Single-step prologue for small / non-128-multiple D (weight fits VMEM).
    w_ref: (3, D, D), b_ref: (3, 1, D)."""
    h = h_ref[...]
    a = jnp.dot(h, w_ref[0], preferred_element_type=jnp.float32) \
        + b_ref[0].astype(jnp.float32)
    mu = jnp.dot(h, w_ref[1], preferred_element_type=jnp.float32) \
        + b_ref[1].astype(jnp.float32)
    s = jnp.dot(h, w_ref[2], preferred_element_type=jnp.float32) \
        + b_ref[2].astype(jnp.float32)
    scale_ref[...] = 1.0 + a * (1.0 + s)
    offset_ref[...] = a * mu


def _adaln_scale_offset(conditioning, weight, bias):
    """Returns (scale, offset), each (B, D) in float32."""
    B, D = conditioning.shape
    w_dtype = weight.dtype
    w_itemsize = jnp.dtype(w_dtype).itemsize

    # SiLU once here (tiny BxD op) instead of re-running it per column tile.
    c = conditioning.astype(jnp.float32)
    h = (c * jax.nn.sigmoid(c)).astype(w_dtype)

    prologue_params = pltpu.CompilerParams(
        dimension_semantics=("parallel",),
        vmem_limit_bytes=48 * _MIB)   # headroom on v5e (16 MiB default scoped)
    out_shape = (jax.ShapeDtypeStruct((B, D), jnp.float32),
                 jax.ShapeDtypeStruct((B, D), jnp.float32))

    if D % 128 == 0:
        # Column-tiled path, no weight transpose: a/mu/s are lane-contiguous
        # column ranges of the (D, 3D) weight, addressed by three BlockSpecs.
        budget = 4 * _MIB                   # weight bytes per grid step
        td = min(D, _round_down_multiple(budget // (3 * D * w_itemsize), 128))
        while D % td != 0:                  # chunk boundaries must line up
            td -= 128
        nblk = D // td
        b2 = bias.reshape(1, 3 * D)

        def w_spec(off):
            return pl.BlockSpec((D, td), lambda j, off=off: (0, off + j))

        def b_spec(off):
            return pl.BlockSpec((1, td), lambda j, off=off: (0, off + j))

        return pl.pallas_call(
            _adaln_tiled_kernel,
            out_shape=out_shape,
            grid_spec=pltpu.PrefetchScalarGridSpec(
                num_scalar_prefetch=0,
                grid=(nblk,),
                in_specs=[
                    pl.BlockSpec((B, D), lambda j: (0, 0)),        # h
                    w_spec(0), w_spec(nblk), w_spec(2 * nblk),     # Wa/Wmu/Ws
                    b_spec(0), b_spec(nblk), b_spec(2 * nblk),     # ba/bmu/bs
                ],
                out_specs=(pl.BlockSpec((B, td), lambda j: (0, j)),
                           pl.BlockSpec((B, td), lambda j: (0, j))),
            ),
            compiler_params=prologue_params,
        )(h, weight, weight, weight, b2, b2, b2)

    # Fallback for toy / non-128-multiple D: (3, D, D) view, one step.
    # The restructure only touches 3*D*D elements and D here is small.
    # TODO(synk): a large D not divisible by 128 would need K-dim tiling here.
    w3 = jnp.transpose(weight.reshape(D, 3, D), (1, 0, 2))
    b3 = bias.reshape(3, 1, D)
    return pl.pallas_call(
        _adaln_full_kernel,
        out_shape=out_shape,
        grid_spec=pltpu.PrefetchScalarGridSpec(
            num_scalar_prefetch=0,
            grid=(1,),
            in_specs=[
                pl.BlockSpec((B, D), lambda j: (0, 0)),
                pl.BlockSpec((3, D, D), lambda j: (0, 0, 0)),
                pl.BlockSpec((3, 1, D), lambda j: (0, 0, 0)),
            ],
            out_specs=(pl.BlockSpec((B, D), lambda j: (0, 0)),
                       pl.BlockSpec((B, D), lambda j: (0, 0))),
        ),
        compiler_params=prologue_params,
    )(h, w3, b3)


# ---------------------------------------------------------------------------
# Streaming kernel: one multiply-add per element of x, tiled over (tiles, B).
# ---------------------------------------------------------------------------
def _modulate_kernel(scale_ref, offset_ref, x_ref, o_ref):
    """scale/offset: (1, 1, L) f32 ; x/o: (1, TN, L) in x.dtype."""
    x = x_ref[...].astype(jnp.float32)
    o_ref[...] = (x * scale_ref[...] + offset_ref[...]).astype(o_ref.dtype)


def time_modulator(x, conditioning, weight, bias):
    """x: (B, N, D), conditioning: (B, D), weight: (D, 3D), bias: (3D,)."""
    B, N, D = x.shape
    dtype = x.dtype
    itemsize = jnp.dtype(dtype).itemsize

    # One-shot prologue; f32 scale/offset keep x's identity path exact.
    scale, offset = _adaln_scale_offset(conditioning, weight, bias)

    # Lane-dense output: fold rows so the last dim is L = lcm(D, 128).
    g = math.gcd(D, 128)
    L = D * (128 // g)
    rep = L // D
    if rep > 1 and (N * D) % L == 0 and rep <= 128:
        scale = jnp.tile(scale, (1, rep))
        offset = jnp.tile(offset, (1, rep))
    else:
        L, rep = D, 1
    M = (N * D) // L

    x_r = x.reshape(B, M, L)                 # contiguous reshape: free
    scale_r = scale.reshape(B, 1, L)
    offset_r = offset.reshape(B, 1, L)

    # Tile size: 2 MiB of x hides per-step overhead at <=1.4 TB/s (v5e/v6e);
    # on v7x (3.2 TB/s HBM) use 6 MiB tiles + raised scoped-VMEM limit so the
    # ~0.35us fixed per-step cost stays <10% of wall time.
    kind = _device_kind()
    if "v7" in kind or "tpu7" in kind:
        target_bytes, stream_vmem = 6 * _MIB, 48 * _MIB
    else:
        target_bytes, stream_vmem = 2 * _MIB, None

    sub = max(8, 32 // itemsize)             # native sublane multiple (f32 8, bf16 16, i8 32)
    tn = min(M, _round_down_multiple(target_bytes // (L * itemsize), sub))
    if tn < M and M % tn != 0:
        # Prefer a tn that divides M (fully unmasked stores) if it stays >= tn/2.
        cand = tn
        while cand >= max(sub, tn // 2):
            if M % cand == 0:
                tn = cand
                break
            cand -= sub
    grid = (pl.cdiv(M, tn), B)               # big axis first: balanced 2-TC split on v7x

    cost = pl.CostEstimate(
        flops=2 * B * N * D,
        transcendentals=0,
        bytes_accessed=2 * B * N * D * itemsize + 2 * B * L * 4)

    stream_params = dict(dimension_semantics=("parallel", "parallel"))
    if stream_vmem is not None:
        stream_params["vmem_limit_bytes"] = stream_vmem

    # TODO(synk): pass input_output_aliases={2: 0} when the caller donates x
    # (removes the extra B*N*D HBM allocation; semantics unchanged).
    out = pl.pallas_call(
        _modulate_kernel,
        out_shape=jax.ShapeDtypeStruct((B, M, L), dtype),
        grid_spec=pltpu.PrefetchScalarGridSpec(
            num_scalar_prefetch=0,
            grid=grid,
            in_specs=[
                pl.BlockSpec((1, 1, L), lambda j, b: (b, 0, 0)),   # scale
                pl.BlockSpec((1, 1, L), lambda j, b: (b, 0, 0)),   # offset
                pl.BlockSpec((1, tn, L), lambda j, b: (b, j, 0)),  # x
            ],
            out_specs=pl.BlockSpec((1, tn, L), lambda j, b: (b, j, 0)),
        ),
        compiler_params=pltpu.CompilerParams(**stream_params),
        cost_estimate=cost,
    )(scale_r, offset_r, x_r)

    return out.reshape(B, N, D)


def time_modulator_ref(x, conditioning, weight, bias):
    """Pure-JAX reference of the PyTorch forward."""
    h = conditioning * jax.nn.sigmoid(conditioning)
    y = h @ weight + bias
    D = x.shape[-1]
    a, mu, s = y[:, :D], y[:, D:2 * D], y[:, 2 * D:]
    out = x * (1.0 + s[:, None, :]) + mu[:, None, :]
    return x + a[:, None, :] * out


if __name__ == "__main__":
    B, N, D = 2, 8, 32
    key = jax.random.PRNGKey(0)
    kx, kc, kw, kb = jax.random.split(key, 4)

    x = jax.random.normal(kx, (B, N, D), dtype=jnp.float32)
    conditioning = jax.random.normal(kc, (B, D), dtype=jnp.float32)
    # Real AdaLN-Zero zero-inits W/b (forward would equal x); use small random
    # params so the full compute path is exercised.
    weight = 0.02 * jax.random.normal(kw, (D, 3 * D), dtype=jnp.float32)
    bias = 0.02 * jax.random.normal(kb, (3 * D,), dtype=jnp.float32)

    out = time_modulator(x, conditioning, weight, bias)
    out = jax.block_until_ready(out)

    ref = time_modulator_ref(x, conditioning, weight, bias)
    assert out.shape == (B, N, D)
    assert jnp.allclose(out, ref, atol=1e-5, rtol=1e-5)

    print("KERNEL_OK")
</pallas_src>

<mosaic_0001>
module attributes {stable_mosaic.version = 11 : i64} {
  func.func @_adaln_full_kernel(%arg0: i32, %arg1: memref<2x32xf32, #tpu.memory_space<vmem>>, %arg2: memref<3x32x32xf32, #tpu.memory_space<vmem>>, %arg3: memref<3x1x32xf32, #tpu.memory_space<vmem>>, %arg4: memref<2x32xf32, #tpu.memory_space<vmem>>, %arg5: memref<2x32xf32, #tpu.memory_space<vmem>>) attributes {dimension_semantics = [#tpu.dimension_semantics<parallel>], iteration_bounds = array<i64: 1>, scalar_prefetch = 0 : i64, scratch_operands = 0 : i64, tpu.core_type = #tpu.core_type<tc>, window_params = [{pipeline_mode = #tpu.pipeline_mode<synchronous>, transform_indices = @transform_0, window_bounds = array<i64: 2, 32>}, {pipeline_mode = #tpu.pipeline_mode<synchronous>, transform_indices = @transform_1, window_bounds = array<i64: 3, 32, 32>}, {pipeline_mode = #tpu.pipeline_mode<synchronous>, transform_indices = @transform_2, window_bounds = array<i64: 3, 1, 32>}, {pipeline_mode = #tpu.pipeline_mode<synchronous>, transform_indices = @transform_3, window_bounds = array<i64: 2, 32>}, {pipeline_mode = #tpu.pipeline_mode<synchronous>, transform_indices = @transform_4, window_bounds = array<i64: 2, 32>}]} {
    %c0 = arith.constant 0 : index
    %c0_0 = arith.constant 0 : index
    %0 = vector.load %arg1[%c0, %c0_0] : memref<2x32xf32, #tpu.memory_space<vmem>>, vector<2x32xf32>
    %c0_1 = arith.constant 0 : index
    %c0_2 = arith.constant 0 : index
    %c0_3 = arith.constant 0 : index
    %1 = vector.load %arg2[%c0_1, %c0_2, %c0_3] : memref<3x32x32xf32, #tpu.memory_space<vmem>>, vector<1x32x32xf32>
    %2 = vector.shape_cast %1 : vector<1x32x32xf32> to vector<32x32xf32>
    %cst = arith.constant dense<0.000000e+00> : vector<2x32xf32>
    %3 = tpu.matmul %0, %2, %cst {dimension_numbers = #tpu.dot_dimension_numbers<[1], [0], [0], [1], [0, 0, 1, 1], [], []>} : vector<2x32xf32>, vector<32x32xf32>, vector<2x32xf32> -> vector<2x32xf32>
    %c0_4 = arith.constant 0 : index
    %c0_5 = arith.constant 0 : index
    %c0_6 = arith.constant 0 : index
    %4 = vector.load %arg3[%c0_4, %c0_5, %c0_6] : memref<3x1x32xf32, #tpu.memory_space<vmem>>, vector<1x1x32xf32>
    %5 = vector.shape_cast %4 : vector<1x1x32xf32> to vector<1x32xf32>
    %6 = vector.broadcast %5 : vector<1x32xf32> to vector<2x32xf32>
    %7 = arith.addf %3, %6 : vector<2x32xf32>
    %c1 = arith.constant 1 : index
    %c0_7 = arith.constant 0 : index
    %c0_8 = arith.constant 0 : index
    %8 = vector.load %arg2[%c1, %c0_7, %c0_8] : memref<3x32x32xf32, #tpu.memory_space<vmem>>, vector<1x32x32xf32>
    %9 = vector.shape_cast %8 : vector<1x32x32xf32> to vector<32x32xf32>
    %cst_9 = arith.constant dense<0.000000e+00> : vector<2x32xf32>
    %10 = tpu.matmul %0, %9, %cst_9 {dimension_numbers = #tpu.dot_dimension_numbers<[1], [0], [0], [1], [0, 0, 1, 1], [], []>} : vector<2x32xf32>, vector<32x32xf32>, vector<2x32xf32> -> vector<2x32xf32>
    %c1_10 = arith.constant 1 : index
    %c0_11 = arith.constant 0 : index
    %c0_12 = arith.constant 0 : index
    %11 = vector.load %arg3[%c1_10, %c0_11, %c0_12] : memref<3x1x32xf32, #tpu.memory_space<vmem>>, vector<1x1x32xf32>
    %12 = vector.shape_cast %11 : vector<1x1x32xf32> to vector<1x32xf32>
    %13 = vector.broadcast %12 : vector<1x32xf32> to vector<2x32xf32>
    %14 = arith.addf %10, %13 : vector<2x32xf32>
    %c2 = arith.constant 2 : index
    %c0_13 = arith.constant 0 : index
    %c0_14 = arith.constant 0 : index
    %15 = vector.load %arg2[%c2, %c0_13, %c0_14] : memref<3x32x32xf32, #tpu.memory_space<vmem>>, vector<1x32x32xf32>
    %16 = vector.shape_cast %15 : vector<1x32x32xf32> to vector<32x32xf32>
    %cst_15 = arith.constant dense<0.000000e+00> : vector<2x32xf32>
    %17 = tpu.matmul %0, %16, %cst_15 {dimension_numbers = #tpu.dot_dimension_numbers<[1], [0], [0], [1], [0, 0, 1, 1], [], []>} : vector<2x32xf32>, vector<32x32xf32>, vector<2x32xf32> -> vector<2x32xf32>
    %c2_16 = arith.constant 2 : index
    %c0_17 = arith.constant 0 : index
    %c0_18 = arith.constant 0 : index
    %18 = vector.load %arg3[%c2_16, %c0_17, %c0_18] : memref<3x1x32xf32, #tpu.memory_space<vmem>>, vector<1x1x32xf32>
    %19 = vector.shape_cast %18 : vector<1x1x32xf32> to vector<1x32xf32>
    %20 = vector.broadcast %19 : vector<1x32xf32> to vector<2x32xf32>
    %21 = arith.addf %17, %20 : vector<2x32xf32>
    %cst_19 = arith.constant 1.000000e+00 : f32
    %22 = vector.broadcast %cst_19 : f32 to vector<2x32xf32>
    %23 = arith.addf %22, %21 : vector<2x32xf32>
    %24 = arith.mulf %7, %23 : vector<2x32xf32>
    %cst_20 = arith.constant 1.000000e+00 : f32
    %25 = vector.broadcast %cst_20 : f32 to vector<2x32xf32>
    %26 = arith.addf %25, %24 : vector<2x32xf32>
    %c0_21 = arith.constant 0 : index
    %c0_22 = arith.constant 0 : index
    %27 = vector.load %arg4[%c0_21, %c0_22] : memref<2x32xf32, #tpu.memory_space<vmem>>, vector<2x32xf32>
    tpu.vector_store %arg4[%c0_21, %c0_22], %26 {strides = array<i32>} : memref<2x32xf32, #tpu.memory_space<vmem>>, vector<2x32xf32>,
    %28 = arith.mulf %7, %14 : vector<2x32xf32>
    %c0_23 = arith.constant 0 : index
    %c0_24 = arith.constant 0 : index
    %29 = vector.load %arg5[%c0_23, %c0_24] : memref<2x32xf32, #tpu.memory_space<vmem>>, vector<2x32xf32>
    tpu.vector_store %arg5[%c0_23, %c0_24], %28 {strides = array<i32>} : memref<2x32xf32, #tpu.memory_space<vmem>>, vector<2x32xf32>,
    return
  }
  func.func @transform_0(%arg0: i32) -> (i32, i32) {
    %c0_i32 = arith.constant 0 : i32
    %c0_i32_0 = arith.constant 0 : i32
    %c0_i32_1 = arith.constant 0 : i32
    return %c0_i32, %c0_i32_0 : i32, i32
  }
  func.func @transform_1(%arg0: i32) -> (i32, i32, i32) {
    %c0_i32 = arith.constant 0 : i32
    %c0_i32_0 = arith.constant 0 : i32
    %c0_i32_1 = arith.constant 0 : i32
    %c0_i32_2 = arith.constant 0 : i32
    return %c0_i32, %c0_i32_0, %c0_i32_1 : i32, i32, i32
  }
  func.func @transform_2(%arg0: i32) -> (i32, i32, i32) {
    %c0_i32 = arith.constant 0 : i32
    %c0_i32_0 = arith.constant 0 : i32
    %c0_i32_1 = arith.constant 0 : i32
    %c0_i32_2 = arith.constant 0 : i32
    return %c0_i32, %c0_i32_0, %c0_i32_1 : i32, i32, i32
  }
  func.func @transform_3(%arg0: i32) -> (i32, i32) {
    %c0_i32 = arith.constant 0 : i32
    %c0_i32_0 = arith.constant 0 : i32
    %c0_i32_1 = arith.constant 0 : i32
    return %c0_i32, %c0_i32_0 : i32, i32
  }
  func.func @transform_4(%arg0: i32) -> (i32, i32) {
    %c0_i32 = arith.constant 0 : i32
    %c0_i32_0 = arith.constant 0 : i32
    %c0_i32_1 = arith.constant 0 : i32
    return %c0_i32, %c0_i32_0 : i32, i32
  }
}

</mosaic_0001>

<bundles_post_ra>
// kernel: tpu_custom_call.1
= control target key start
LH: loop header
LB: loop body
LE: loop exit
PB: predicated region body
PF: predicated region fallthrough
CT: control target
= control target key end

     0   :  { %10 = vsyncpa [#allocation3], 0  ;;  %s615_s0 = inlined_call_operand.hbm [shape: f32[2,32], index: 0, kind: input, shape index: {}]   ;;  %s616_s1 = inlined_call_operand.hbm [shape: f32[3,32,32], index: 1, kind: input, shape index: {}]   ;;  %s617_s2 = inlined_call_operand.vmem [shape: f32[3,1,32], index: 2, kind: input, shape index: {}]   ;;  %s618_s3 = inlined_call_operand.hbm [shape: f32[2,32], index: 3, kind: output, shape index: {0}]   ;;  %s619_s4 = inlined_call_operand.hbm [shape: f32[2,32], index: 4, kind: output, shape index: {1}]  }
   0x1   :  { %11 = vsyncpa [#allocation6], 0 }
   0x2   :  { %12 = vsyncpa [#allocation4], 0 }
   0x3   :  { %13 = vsyncpa [#allocation9], 0  ;;  %s512_s15 = smov [#allocation2]   ;;  %s513_s17 = smov [#allocation5]  }
   0x4   :  { %s20_s16 = sshll.u32 %s512_s15, 4  ;;  %s29_s18 = sshll.u32 %s513_s17, 4  ;;  %s21_s16 = int_to_ptr.vmem [resolvable:$true] %s20_s16  ;;  %s546_s18 = int_to_ptr.vmem [resolvable:$true] %s29_s18 }
   0x5   :  { %s416_s21 = scalar_lea.hbm %s615_s0, 32 }
   0x6   :  { %p417_p0 = scmp.ne.s32.totalorder %s615_s0, %s416_s21  ;;  %p420_p1 = scmp.lt.u32.totalorder %s416_s21, %s615_s0 }
   0x8   :  { %p422_p2 = pnand %p420_p1, %p417_p0 }
   0xa   :  { %425 = shalt.err (!%p422_p2)
}
   0xb   :  { %s426_s26 = scalar_lea.vmem %s21_s16, 32  ;;  %p431_p4 = scmp.lt.s32.totalorder %s21_s16, %s21_s16 }
   0xc   :  { %p427_p3 = scmp.ne.s32.totalorder %s21_s16, %s426_s26  ;;  %p432_p5 = scmp.lt.s32.totalorder %s426_s26, %s426_s26 }
   0xe   :  { %p433_p6 = por %p432_p5, %p431_p4 }
  0x10   :  { %p434_p7 = pnand %p433_p6, %p427_p3 }
  0x12   :  { %437 = shalt.err (!%p434_p7)
}
  0x13   :  { %23 = dma.hbm_to_vmem [thread:$0]  %s615_s0, 32, %s21_s16, [#allocation3]  }
  0x14   :  { %s438_s5 = scalar_lea.hbm %s616_s1, 1536 }
  0x15   :  { %p439_p8 = scmp.ne.s32.totalorder %s616_s1, %s438_s5  ;;  %p442_p9 = scmp.lt.u32.totalorder %s438_s5, %s616_s1 }
  0x17   :  { %p444_p10 = pnand %p442_p9, %p439_p8 }
  0x19   :  { %447 = shalt.err (!%p444_p10)
}
  0x1a   :  { %s448_s10 = scalar_lea.vmem %s546_s18, 1536  ;;  %p453_p12 = scmp.lt.s32.totalorder %s546_s18, %s546_s18 }
  0x1b   :  { %p449_p11 = scmp.ne.s32.totalorder %s546_s18, %s448_s10  ;;  %p454_p13 = scmp.lt.s32.totalorder %s448_s10, %s448_s10 }
  0x1d   :  { %p455_p0 = por %p454_p13, %p453_p12 }
  0x1f   :  { %p456_p1 = pnand %p455_p0, %p449_p11 }
  0x21   :  { %459 = shalt.err (!%p456_p1)
}
  0x22   :  { %s514_s0 = smov 128   ;;  %s515_s11 = smov 8  }
  0x23   :  { %35 = dma.hbm_to_vmem [thread:$0]  %s616_s1, 1536, %s546_s18, [#allocation6], %s514_s0, %s514_s0, %s515_s11  }
  0x24   :  { %504 = dma.done.wait [#allocation3], 32  }
  0x25   :  { %505 = vsyncadd [#allocation3], 4294967264 }
  0x26   :  { %506 = dma.done.wait [#allocation6], 1536  }
  0x27   :  { %507 = vsyncadd [#allocation6], 4294965760  ;;  %v516_v0 = vmov 0.0|0.0   ;;  %vm517_vm0 = vmmov 0   ;;  %v518_v1 = vmov 0.0   ;;  %v45_v2 = vld [vmem:[#allocation5] sm:$0xff] }
  0x28   :  { %389 = vmatprep.subr.bf16.mxu0 %v516_v0  ;;  %395 = vmatprep.subr.bf16.mxu1 %v516_v0  ;;  %v46_v3 = vld [vmem:[#allocation5 + $0x8] sm:$0xff]  ;;  %v131_v4 = vld [vmem:[#allocation5 + $0x20] sm:$0xff]  ;;  %v47_v7 = vld [vmem:[#allocation5 + $0x10] sm:$0xff]  ;;  %vm56_vm1 = vcmask 261120   ;;  %s519_s17 = smov [#allocation8]   ;;  %vm299_vm2 = vcmask 254976  }
  0x29   :  { %364 = vmatprep.mubr.msk.f32.mxu0 %vm517_vm0, %v518_v1  ;;  %375 = vmatprep.mubr.msk.f32.mxu1 %vm517_vm0, %v518_v1  ;;  %v390_v5 = vpack.c.bf16 %v46_v3, %v45_v2  ;;  %v132_v6 = vld [vmem:[#allocation5 + $0x28] sm:$0xff]  ;;  %v48_v8 = vld [vmem:[#allocation5 + $0x18] sm:$0xff]  ;;  %v133_v10 = vld [vmem:[#allocation5 + $0x30] sm:$0xff]  ;;  %s319_s18 = sshll.u32 %s519_s17, 4  ;;  %s320_s18 = int_to_ptr.vmem [resolvable:$true] %s319_s18 }
  0x2a   :  { %v396_v9 = vpack.c.bf16 %v132_v6, %v131_v4  ;;  %v134_v11 = vld [vmem:[#allocation5 + $0x38] sm:$0xff]  ;;  %v393_v12 = vpack.c.bf16 %v48_v8, %v47_v7  ;;  %v214_v14 = vld [vmem:[#allocation5 + $0x40] sm:$0xff]  ;;  %v215_v15 = vld [vmem:[#allocation5 + $0x48] sm:$0xff]  ;;  %s460_s21 = scalar_lea.vmem %s320_s18, 32  ;;  %p465_p3 = scmp.lt.s32.totalorder %s320_s18, %s320_s18 }
  0x2b   :  { %391 = vmatpush3.bf16.msra.mxu0 %v390_v5  ;;  %v399_v13 = vpack.c.bf16 %v134_v11, %v133_v10  ;;  %v44_v16 = vld [vmem:[#allocation2] sm:$0x3]  ;;  %v402_v17 = vpack.c.bf16 %v215_v15, %v214_v14  ;;  %v216_v18 = vld [vmem:[#allocation5 + $0x50] sm:$0xff]  ;;  %v339_v30 = vld [vmem:[%s617_s2 + $0x2] ss:$0 sm:$0xff]  ;;  %p461_p2 = scmp.ne.s32.totalorder %s320_s18, %s460_s21  ;;  %p466_p4 = scmp.lt.s32.totalorder %s460_s21, %s460_s21 }
  0x2c   :  { %397 = vmatpush3.bf16.msra.mxu1 %v396_v9  ;;  %392 = vmatprep.subr.bf16.mxu0 %v516_v0  ;;  %v217_v19 = vld [vmem:[#allocation5 + $0x58] sm:$0xff]  ;;  %v333_v21 = vld [vmem:[%s617_s2] ss:$0 sm:$0xff]  ;;  %v336_v22 = vld [vmem:[%s617_s2 + $0x1] ss:$0 sm:$0xff] }
  0x2d   :  { %398 = vmatprep.subr.bf16.mxu1 %v516_v0  ;;  %v405_v20 = vpack.c.bf16 %v217_v19, %v216_v18  ;;  %p467_p5 = por %p466_p4, %p465_p3 }
  0x2f   :  { %394 = vmatpush3.bf16.msra.mxu0 %v393_v12  ;;  %p468_p6 = pnand %p467_p5, %p461_p2 }
  0x30   :  { %400 = vmatpush3.bf16.msra.mxu1 %v399_v13  ;;  %401 = vmatprep.subr.bf16.mxu0 %v516_v0 }
  0x32   :  { %365 = vmatmul.mubr.msk.f32.vlgmr.msra.gmra.mrb[0].mxu0 %vm56_vm1, %v44_v16 }
  0x33   :  { %376 = vmatmul.mubr.msk.f32.vlgmr.msra.gmra.mrb[0].mxu1 %vm56_vm1, %v44_v16  ;;  %403 = vmatpush3.bf16.msra.mxu0 %v402_v17 }
  0x34   :  { %404 = vmatprep.subr.bf16.mxu0 %v516_v0  ;;  %386 = vmatprep.mubr.msk.f32.mxu0 %vm517_vm0, %v518_v1 }
  0x37   :  { %406 = vmatpush3.bf16.msra.mxu0 %v405_v20 }
  0x3a   :  { %387 = vmatmul.mubr.msk.f32.vlgmr.msra.gmra.mrb[2].mxu0 %vm56_vm1, %v44_v16 }
 0x105   :  { %v126_v23 = vpop.f32.mrb[0].mxu0 }
 0x106   :  { %v127_v24 = vadd.f32 %v333_v21, %v126_v23  ;;  %v366_v25 = vpop.f32.mrb[1].mxu0  ;;  %v209_v26 = vpop.f32.mrb[0].mxu1 }
 0x107   :  { %v210_v27 = vadd.f32 %v336_v22, %v209_v26  ;;  %v377_v28 = vpop.f32.mrb[1].mxu1 }
 0x109   :  { %v301_v29 = vmul.f32 %v210_v27, %v127_v24 }
 0x10b   :  { %302 = vst.msk [vmem:[#allocation8] sm:$0x3] %vm299_vm2, %v301_v29 }
 0x10c   :  { %471 = shalt.err (!%p468_p6)
}
 0x10d   :  { %s472_s24 = scalar_lea.hbm %s619_s4, 32 }
 0x10e   :  { %p473_p7 = scmp.ne.s32.totalorder %s619_s4, %s472_s24  ;;  %p476_p8 = scmp.lt.u32.totalorder %s472_s24, %s619_s4 }
 0x110   :  { %p478_p9 = pnand %p476_p8, %p473_p7 }
 0x112   :  { %481 = shalt.err (!%p478_p9)
}
 0x113   :  { %322 = dma.vmem_to_hbm [thread:$0]  %s320_s18, 32, %s619_s4, [#allocation9]   ;;  %v292_v31 = vpop.f32.mrb[2].mxu0 }
 0x114   :  { %v293_v32 = vadd.f32 %v339_v30, %v292_v31  ;;  %v388_v33 = vpop.f32.mrb[3].mxu0  ;;  %s520_s30 = smov [#allocation7]  }
 0x115   :  { %s309_s5 = sshll.u32 %s520_s30, 4  ;;  %s310_s5 = int_to_ptr.vmem [resolvable:$true] %s309_s5 }
 0x116   :  { %v296_v34 = vadd.f32 1.0, %v293_v32  ;;  %s482_s6 = scalar_lea.vmem %s310_s5, 32  ;;  %p487_p11 = scmp.lt.s32.totalorder %s310_s5, %s310_s5 }
 0x117   :  { %p483_p10 = scmp.ne.s32.totalorder %s310_s5, %s482_s6  ;;  %p488_p12 = scmp.lt.s32.totalorder %s482_s6, %s482_s6 }
 0x118   :  { %v297_v35 = vmul.f32 %v296_v34, %v127_v24 }
 0x119   :  { %p489_p13 = por %p488_p12, %p487_p11 }
 0x11a   :  { %v298_v36 = vadd.f32 1.0, %v297_v35 }
 0x11b   :  { %p490_p0 = pnand %p489_p13, %p483_p10 }
 0x11c   :  { %300 = vst.msk [vmem:[#allocation7] sm:$0x3] %vm299_vm2, %v298_v36 }
 0x11d   :  { %493 = shalt.err (!%p490_p0)
}
 0x11e   :  { %s494_s8 = scalar_lea.hbm %s618_s3, 32 }
 0x11f   :  { %p495_p1 = scmp.ne.s32.totalorder %s618_s3, %s494_s8  ;;  %p498_p2 = scmp.lt.u32.totalorder %s494_s8, %s618_s3 }
 0x121   :  { %p500_p3 = pnand %p498_p2, %p495_p1 }
 0x123   :  { %503 = shalt.err (!%p500_p3)
}
 0x124   :  { %312 = dma.vmem_to_hbm [thread:$0]  %s310_s5, 32, %s618_s3, [#allocation4]  }
 0x125   :  { %508 = dma.done.wait [#allocation4], 32  }
 0x126   :  { %509 = vsyncadd [#allocation4], 4294967264 }
 0x127   :  { %510 = dma.done.wait [#allocation9], 32  }
 0x128   :  { %511 = vsyncadd [#allocation9], 4294967264 }
 0x129   :  { %329 = vsyncpa [#allocation3], 1 }
 0x12a   :  { %330 = vsyncpa [#allocation6], 1 }
 0x12b   :  { %331 = vsyncpa [#allocation4], 1 }
 0x12c   :  { %332 = vsyncpa [#allocation9], 1 }

</bundles_post_ra>
